<compile_context>
chip_gen: v5e
topology: v5e:2x2
jax: 0.10.0
libtpu: 0.0.40
codegen_flags: <defaults>
</compile_context>

<pallas_src>
import jax
import jax.numpy as jnp
from jax.experimental import pallas as pl
from jax.experimental.pallas import tpu as pltpu

_LANE = 128


def _round_up(x: int, m: int) -> int:
    return ((x + m - 1) // m) * m


def _vmem_budget_bytes() -> int:
    """Usable VMEM per TensorCore, with headroom for compiler-internal scratch."""
    try:
        cap = int(pltpu.get_tpu_info().vmem_capacity_bytes)
    except Exception:  # query unavailable -> assume the smallest generation (v7x)
        cap = 64 << 20
    # ~16 MiB headroom; never ask for more than ~100 MiB even on 128 MiB parts.
    return int(min(max(cap - (16 << 20), 24 << 20), 100 << 20))


def _choose_tiles(M, K, N_pad, x_item, w_item, o_item, budget, tm_req):
    """Pick (tm, tn, tk) fitting `budget` bytes of VMEM.

    Preference order (per perf review): whole weight resident along N first
    (tn = N_pad), shrinking tm before shrinking tn.
    """
    row_g = 16 if x_item == 2 else 8  # bf16 packs 2 rows per sublane

    # K tile: keep the whole contraction resident unless it is very wide; only
    # split when it divides exactly (partial K blocks would fold unspecified
    # OOB values into the accumulation).
    tk = K
    if K > 2048:
        for cand in (2048, 1024, 512, 256, 128):
            if K % cand == 0:
                tk = cand
                break
    nk = pl.cdiv(K, tk)

    tm_top = min(_round_up(tm_req, row_g), _round_up(M, row_g))
    tm_cands = []
    t = tm_top
    while True:
        tm_cands.append(t)
        if t <= row_g:
            break
        nxt = max(row_g, _round_up(t // 2, row_g))
        if nxt == t:
            break
        t = nxt

    tn_cands = [N_pad] + [c for c in (1024, 512, 256, 128) if c < N_pad]

    def vmem_cost(tm_, tn_):
        n_n = pl.cdiv(N_pad, tn_)
        w_bufs = 1 if (n_n == 1 and nk == 1) else 2
        b_bufs = 1 if n_n == 1 else 2
        return (2 * tm_ * tk * x_item          # activation tile (double-buffered)
                + w_bufs * tk * tn_ * w_item   # weight tile
                + b_bufs * tn_ * 4             # bias tile (f32)
                + 2 * tm_ * tn_ * o_item       # output tile (double-buffered)
                + tm_ * tn_ * 4)               # f32 accumulator scratch

    for tn_ in tn_cands:
        for tm_ in tm_cands:
            if vmem_cost(tm_, tn_) <= budget:
                return tm_, tn_, tk
    # Nothing fits at the minimum row tile: fall back to the smallest legal
    # tiling and let the compiler limit cover the rest.
    return row_g, _LANE, tk


def mlp_kernel(x_ref, w_ref, b_ref, o_ref, acc_ref):
    # x_ref: (tm, tk)  w_ref: (tk, tn)  b_ref: (1, tn)  o_ref/acc_ref: (tm, tn)
    k = pl.program_id(2)

    @pl.when(k == 0)
    def _():
        acc_ref[...] = jnp.zeros_like(acc_ref)

    acc_ref[...] += jnp.dot(x_ref[...], w_ref[...],
                            preferred_element_type=jnp.float32)

    @pl.when(k == pl.num_programs(2) - 1)
    def _():
        y = acc_ref[...] + b_ref[...].astype(jnp.float32)
        # tanh on the EUP; expmap0's result is discarded by the reference
        # module (h = y overwrite), so it is intentionally not computed here.
        # TODO(synk): if profiling shows the EUP (not HBM) binds on v5e for
        # small K, swap in a VPU polynomial tanh.
        o_ref[...] = jnp.tanh(y).astype(o_ref.dtype)


def mlp_layer(features, weight_t, bias, *, tm=512, out_dtype=None):
    """features: [batch, seq, K]; weight_t: [K, N]; bias: [N] -> [batch, seq, N].

    Computes tanh(features @ weight_t + bias) == MLPLayer.forward.
    """
    batch, seq, K = features.shape
    Kw, N = weight_t.shape
    assert Kw == K, (Kw, K)
    M = batch * seq

    x_dtype = features.dtype
    if out_dtype is None:
        out_dtype = x_dtype  # bf16 in -> bf16 out halves writeback bytes

    # Stream the (tiny, reused) weight in the activations' dtype when they
    # arrive in bf16; do NOT cast the activation slab in the wrapper (that
    # would add a full extra HBM pass). Bias stays f32.
    w_dtype = jnp.bfloat16 if x_dtype == jnp.bfloat16 else weight_t.dtype

    x_item = jnp.dtype(x_dtype).itemsize
    w_item = jnp.dtype(w_dtype).itemsize
    o_item = jnp.dtype(out_dtype).itemsize

    N_pad = _round_up(N, _LANE)
    budget = _vmem_budget_bytes()
    tm_eff, tn_eff, tk_eff = _choose_tiles(M, K, N_pad, x_item, w_item, o_item,
                                           budget, tm)

    n_m = pl.cdiv(M, tm_eff)   # partial last row block handled by Pallas
    n_n = pl.cdiv(N_pad, tn_eff)
    nk = pl.cdiv(K, tk_eff)

    x2d = features.reshape(M, K)            # free reshape; no padding along M
    w2d = weight_t.astype(w_dtype)
    b2d = bias.reshape(1, N).astype(jnp.float32)
    if N_pad != N:                          # pad only the small weight/bias along N
        w2d = jnp.pad(w2d, ((0, 0), (0, N_pad - N)))
        b2d = jnp.pad(b2d, ((0, 0), (0, N_pad - N)))

    # Lane-aligned N: emit the output unpadded so no post-slice pass is needed.
    out_N = N if N_pad == N else N_pad

    # Constant-index weight/bias blocks don't need a second pipeline buffer;
    # only bother when the block is big enough for the saved VMEM to matter.
    single_buffer = (n_n == 1 and nk == 1) and (K * tn_eff * w_item >= (2 << 20))
    wb_kwargs = dict(pipeline_mode=pl.Buffered(1)) if single_buffer else {}

    out2d = pl.pallas_call(
        mlp_kernel,
        out_shape=jax.ShapeDtypeStruct((M, out_N), out_dtype),
        grid_spec=pltpu.PrefetchScalarGridSpec(
            num_scalar_prefetch=0,
            grid=(n_m, n_n, nk),
            in_specs=[
                pl.BlockSpec((tm_eff, tk_eff), lambda i, j, k: (i, k)),
                pl.BlockSpec((tk_eff, tn_eff), lambda i, j, k: (k, j), **wb_kwargs),
                pl.BlockSpec((1, tn_eff), lambda i, j, k: (0, j), **wb_kwargs),
            ],
            out_specs=pl.BlockSpec((tm_eff, tn_eff), lambda i, j, k: (i, j)),
            scratch_shapes=[pltpu.VMEM((tm_eff, tn_eff), jnp.float32)],
        ),
        compiler_params=pltpu.CompilerParams(
            dimension_semantics=("parallel", "parallel", "arbitrary"),
            vmem_limit_bytes=int(budget),
        ),
    )(x2d, w2d, b2d)

    if out_N != N:
        out2d = out2d[:, :N]
    return out2d.reshape(batch, seq, N)


if __name__ == "__main__":
    # Small shapes implied by the module: features [batch, seq, euclidean_size]
    batch, seq = 2, 8
    euclidean_size, hyperbolic_size = 32, 32

    key = jax.random.PRNGKey(0)
    kx, kw, kb = jax.random.split(key, 3)

    features = jax.random.normal(kx, (batch, seq, euclidean_size), dtype=jnp.float32)

    # nn.Linear default init: U(-1/sqrt(K), 1/sqrt(K)); PyTorch weight is
    # [N, K] -- stored transposed [K, N] for the kernel.
    bound = 1.0 / (euclidean_size ** 0.5)
    weight_t = jax.random.uniform(kw, (euclidean_size, hyperbolic_size),
                                  minval=-bound, maxval=bound, dtype=jnp.float32)
    bias = jax.random.uniform(kb, (hyperbolic_size,),
                              minval=-bound, maxval=bound, dtype=jnp.float32)

    ref = jnp.tanh(features @ weight_t + bias)

    # Exact f32 path.
    out = jax.block_until_ready(mlp_layer(features, weight_t, bias))
    assert out.shape == (batch, seq, hyperbolic_size)
    assert jnp.allclose(out, ref, atol=1e-5, rtol=1e-5), "mismatch vs reference (f32)"

    # Activations already arriving in bf16 (no wrapper cast of x); weight
    # streamed bf16, f32 accumulate, bf16 writeback.
    feats_bf16 = features.astype(jnp.bfloat16)
    out_bf16 = jax.block_until_ready(mlp_layer(feats_bf16, weight_t, bias))
    assert out_bf16.dtype == jnp.bfloat16
    assert out_bf16.shape == (batch, seq, hyperbolic_size)
    assert jnp.allclose(out_bf16.astype(jnp.float32), ref, atol=3e-2, rtol=3e-2), \
        "mismatch vs reference (bf16)"

    # Non-divisible M: partial last row block handled by Pallas (no pad/slice).
    feats_odd = jax.random.normal(kx, (3, 7, euclidean_size), dtype=jnp.float32)
    ref_odd = jnp.tanh(feats_odd @ weight_t + bias)
    out_odd = jax.block_until_ready(mlp_layer(feats_odd, weight_t, bias, tm=8))
    assert out_odd.shape == (3, 7, hyperbolic_size)
    assert jnp.allclose(out_odd, ref_odd, atol=1e-5, rtol=1e-5), \
        "mismatch vs reference (partial M block)"

    print("KERNEL_OK")
</pallas_src>

<mosaic_0001>
module attributes {stable_mosaic.version = 11 : i64} {
  func.func @mlp_kernel(%arg0: i32, %arg1: i32, %arg2: i32, %arg3: memref<16x32xf32, #tpu.memory_space<vmem>>, %arg4: memref<32x128xf32, #tpu.memory_space<vmem>>, %arg5: memref<1x128xf32, #tpu.memory_space<vmem>>, %arg6: memref<16x128xf32, #tpu.memory_space<vmem>>, %arg7: memref<16x128xf32, #tpu.memory_space<vmem>>) attributes {dimension_semantics = [#tpu.dimension_semantics<parallel>, #tpu.dimension_semantics<parallel>, #tpu.dimension_semantics<arbitrary>], iteration_bounds = array<i64: 1, 1, 1>, scalar_prefetch = 0 : i64, scratch_operands = 1 : i64, tpu.core_type = #tpu.core_type<tc>, window_params = [{transform_indices = @transform_0, window_bounds = array<i64: 16, 32>}, {transform_indices = @transform_1, window_bounds = array<i64: 32, 128>}, {transform_indices = @transform_2, window_bounds = array<i64: 1, 128>}, {transform_indices = @transform_3, window_bounds = array<i64: 16, 128>}]} {
    %c0_i32 = arith.constant 0 : i32
    %0 = arith.cmpi eq, %arg2, %c0_i32 : i32
    %1 = arith.extui %0 : i1 to i32
    %c0_i32_0 = arith.constant 0 : i32
    %2 = arith.cmpi ne, %1, %c0_i32_0 : i32
    scf.if %2 {
      %cst_10 = arith.constant 0.000000e+00 : f32
      %12 = vector.broadcast %cst_10 : f32 to vector<16x128xf32>
      %c0_11 = arith.constant 0 : index
      %c0_12 = arith.constant 0 : index
      %13 = vector.load %arg7[%c0_11, %c0_12] : memref<16x128xf32, #tpu.memory_space<vmem>>, vector<16x128xf32>
      tpu.vector_store %arg7[%c0_11, %c0_12], %12 {strides = array<i32>} : memref<16x128xf32, #tpu.memory_space<vmem>>, vector<16x128xf32>,
    } else {
    }
    %c0 = arith.constant 0 : index
    %c0_1 = arith.constant 0 : index
    %3 = vector.load %arg7[%c0, %c0_1] : memref<16x128xf32, #tpu.memory_space<vmem>>, vector<16x128xf32>
    %c0_2 = arith.constant 0 : index
    %c0_3 = arith.constant 0 : index
    %4 = vector.load %arg3[%c0_2, %c0_3] : memref<16x32xf32, #tpu.memory_space<vmem>>, vector<16x32xf32>
    %c0_4 = arith.constant 0 : index
    %c0_5 = arith.constant 0 : index
    %5 = vector.load %arg4[%c0_4, %c0_5] : memref<32x128xf32, #tpu.memory_space<vmem>>, vector<32x128xf32>
    %cst = arith.constant dense<0.000000e+00> : vector<16x128xf32>
    %6 = tpu.matmul %4, %5, %cst {dimension_numbers = #tpu.dot_dimension_numbers<[1], [0], [0], [1], [0, 0, 1, 1], [], []>} : vector<16x32xf32>, vector<32x128xf32>, vector<16x128xf32> -> vector<16x128xf32>
    %7 = arith.addf %3, %6 : vector<16x128xf32>
    %c0_6 = arith.constant 0 : index
    %c0_7 = arith.constant 0 : index
    %8 = vector.load %arg7[%c0_6, %c0_7] : memref<16x128xf32, #tpu.memory_space<vmem>>, vector<16x128xf32>
    tpu.vector_store %arg7[%c0_6, %c0_7], %7 {strides = array<i32>} : memref<16x128xf32, #tpu.memory_space<vmem>>, vector<16x128xf32>,
    %c0_i32_8 = arith.constant 0 : i32
    %9 = arith.cmpi eq, %arg2, %c0_i32_8 : i32
    %10 = arith.extui %9 : i1 to i32
    %c0_i32_9 = arith.constant 0 : i32
    %11 = arith.cmpi ne, %10, %c0_i32_9 : i32
    scf.if %11 {
      %c0_10 = arith.constant 0 : index
      %c0_11 = arith.constant 0 : index
      %12 = vector.load %arg7[%c0_10, %c0_11] : memref<16x128xf32, #tpu.memory_space<vmem>>, vector<16x128xf32>
      %c0_12 = arith.constant 0 : index
      %c0_13 = arith.constant 0 : index
      %13 = vector.load %arg5[%c0_12, %c0_13] : memref<1x128xf32, #tpu.memory_space<vmem>>, vector<1x128xf32>
      %14 = vector.broadcast %13 : vector<1x128xf32> to vector<16x128xf32>
      %15 = arith.addf %12, %14 : vector<16x128xf32>
      %16 = math.tanh %15 : vector<16x128xf32>
      %c0_14 = arith.constant 0 : index
      %c0_15 = arith.constant 0 : index
      %17 = vector.load %arg6[%c0_14, %c0_15] : memref<16x128xf32, #tpu.memory_space<vmem>>, vector<16x128xf32>
      tpu.vector_store %arg6[%c0_14, %c0_15], %16 {strides = array<i32>} : memref<16x128xf32, #tpu.memory_space<vmem>>, vector<16x128xf32>,
    } else {
    }
    return
  }
  func.func @transform_0(%arg0: i32, %arg1: i32, %arg2: i32) -> (i32, i32) {
    %c0_i32 = arith.constant 0 : i32
    return %arg0, %arg2 : i32, i32
  }
  func.func @transform_1(%arg0: i32, %arg1: i32, %arg2: i32) -> (i32, i32) {
    %c0_i32 = arith.constant 0 : i32
    return %arg2, %arg1 : i32, i32
  }
  func.func @transform_2(%arg0: i32, %arg1: i32, %arg2: i32) -> (i32, i32) {
    %c0_i32 = arith.constant 0 : i32
    %c0_i32_0 = arith.constant 0 : i32
    return %c0_i32, %arg1 : i32, i32
  }
  func.func @transform_3(%arg0: i32, %arg1: i32, %arg2: i32) -> (i32, i32) {
    %c0_i32 = arith.constant 0 : i32
    return %arg0, %arg1 : i32, i32
  }
}

</mosaic_0001>

<bundles_post_ra>
// kernel: tpu_custom_call.1
= control target key start
LH: loop header
LB: loop body
LE: loop exit
PB: predicated region body
PF: predicated region fallthrough
CT: control target
= control target key end

     0   :  { %8 = vsyncpa [#allocation4], 0  ;;  %s270_s0 = inlined_call_operand.hbm [shape: f32[16,32], index: 0, kind: input, shape index: {}]   ;;  %s271_s1 = inlined_call_operand.hbm [shape: f32[32,128], index: 1, kind: input, shape index: {}]   ;;  %s272_s2 = inlined_call_operand.vmem [shape: f32[1,128], index: 2, kind: input, shape index: {}]   ;;  %s273_s3 = inlined_call_operand.hbm [shape: f32[16,128], index: 3, kind: output, shape index: {}]  }
   0x1   :  { %9 = vsyncpa [#allocation7], 0 }
   0x2   :  { %10 = vsyncpa [#allocation5], 0  ;;  %s15_s14 = sshll.u32 %s270_s0, 4  ;;  %s224_s15 = smov [#allocation3]   ;;  %s16_s14 = int_to_ptr.hbm [resolvable:$true] %s15_s14 }
   0x3   :  { %s17_s16 = sshll.u32 %s224_s15, 4  ;;  %s28_s19 = sshll.u32 %s271_s1, 4  ;;  %s18_s16 = int_to_ptr.vmem [resolvable:$true] %s17_s16  ;;  %s29_s19 = int_to_ptr.hbm [resolvable:$true] %s28_s19 }
   0x4   :  { %s225_s20 = smov 128   ;;  %s226_s21 = smov 8  }
   0x5   :  { %23 = dma.hbm_to_vmem [thread:$0]  %s16_s14, 256, %s18_s16, [#allocation4], %s225_s20, %s225_s20, %s226_s21  }
   0x6   :  { %s227_s22 = smov [#allocation6]  }
   0x7   :  { %s30_s23 = sshll.u32 %s227_s22, 4  ;;  %s31_s23 = int_to_ptr.vmem [resolvable:$true] %s30_s23 }
   0x8   :  { %36 = dma.hbm_to_vmem [thread:$0]  %s29_s19, 512, %s31_s23, [#allocation7], %s225_s20, %s225_s20, %s226_s21  }
   0x9   :  { %218 = dma.done.wait [#allocation4], 256  }
   0xa   :  { %219 = vsyncadd [#allocation4], 4294967040 }
   0xb   :  { %220 = dma.done.wait [#allocation7], 512  }
   0xc   :  { %221 = vsyncadd [#allocation7], 4294966784  ;;  %v60_v0 = vld [vmem:[#allocation6 + $0x18] sm:$0xff]  ;;  %v59_v1 = vld [vmem:[#allocation6 + $0x10] sm:$0xff]  ;;  %vm61_vm0 = vcmask 261120   ;;  %s228_s24 = smov [#allocation8]  }
   0xd   :  { %80 = vmatpush.msra.mxu0 %v60_v0  ;;  %132 = vmatpush.msra.mxu1 %v60_v0  ;;  %v58_v2 = vld [vmem:[#allocation6 + $0x8] sm:$0xff]  ;;  %v57_v3 = vld [vmem:[#allocation6] sm:$0xff]  ;;  %v55_v4 = vld [vmem:[#allocation3] sm:$0xff]  ;;  %s114_s25 = sshll.u32 %s228_s24, 4  ;;  %s116_s28 = sshll.u32 %s273_s3, 4  ;;  %s115_s25 = int_to_ptr.vmem [resolvable:$true] %s114_s25  ;;  %s117_s28 = int_to_ptr.hbm [resolvable:$true] %s116_s28 }
   0xe   :  { %v56_v5 = vld [vmem:[#allocation3 + $0x8] sm:$0xff]  ;;  %v141_v6 = vld [vmem:[%s272_s2] ss:$0 sm:$0xff] }
   0xf   :  { %81 = vmatpush.msra.mxu0 %v59_v1  ;;  %133 = vmatpush.msra.mxu1 %v59_v1 }
  0x11   :  { %82 = vmatpush.msra.mxu0 %v58_v2  ;;  %134 = vmatpush.msra.mxu1 %v58_v2 }
  0x13   :  { %83 = vmatpush.msra.mxu0 %v57_v3  ;;  %135 = vmatpush.msra.mxu1 %v57_v3 }
  0x14   :  { %130 = vmatmul.msk.f32.vlgmr.msra.gmra.mxu0 %vm61_vm0, %v55_v4  ;;  %131 = vmatmul.msk.f32.vlgmr.msra.gmra.mxu1 %vm61_vm0, %v56_v5 }
  0x91   :  { %v85_v7 = vpop.f32.mrf.mxu0  ;;  %v88_v8 = vpop.f32.mrf.mxu1 }
  0x92   :  { %v104_v9 = vadd.f32 %v141_v6, %v85_v7  ;;  %v105_v10 = vadd.f32 %v141_v6, %v88_v8 }
  0x94   :  { %142 = vtanh.f32 %v104_v9 }
  0x95   :  { %144 = vtanh.f32 %v105_v10 }
  0x9a   :  { %v143_v11 = vpop.eup %142 }
  0x9b   :  { %v145_v12 = vpop.eup %144  ;;  %108 = vst [vmem:[#allocation8] sm:$0xff] %v143_v11 }
  0x9c   :  { %109 = vst [vmem:[#allocation8 + $0x8] sm:$0xff] %v145_v12 }
  0x9d   :  { %122 = dma.vmem_to_hbm [thread:$0]  %s115_s25, 256, %s117_s28, [#allocation5], %s225_s20, %s225_s20, %s226_s21  }
  0x9e   :  { %222 = dma.done.wait [#allocation5], 256  }
  0x9f   :  { %223 = vsyncadd [#allocation5], 4294967040 }
  0xa0   :  { %127 = vsyncpa [#allocation4], 1 }
  0xa1   :  { %128 = vsyncpa [#allocation7], 1 }
  0xa2   :  { %129 = vsyncpa [#allocation5], 1 }

</bundles_post_ra>
